<compile_context>
chip_gen: v7x
topology: tpu7x:2x2x1
jax: 0.10.0
libtpu: 0.0.40
codegen_flags: <defaults>
</compile_context>

<pallas_src>
import functools

import jax
import jax.numpy as jnp
import numpy as np
from jax.experimental import pallas as pl
from jax.experimental.pallas import tpu as pltpu


def _sobelxy_kernel(m_ref, x_ref, o_ref, *, shift_w):
    """m_ref: (8, HW) resident border masks; x_ref/o_ref: (bc, HW) blocks.

    Each row of x_ref/o_ref is one flattened (H, W) plane (depthwise conv =>
    planes are independent, so intra-row rolls never bleed across planes).
    """
    x = x_ref[...].astype(m_ref.dtype)
    hw = x.shape[1]

    # Precomputed zero-padding masks (1.0 inside the image, 0.0 on the border
    # that a given tap would wrap onto).  (1, HW) broadcasts over the block.
    m_up = m_ref[0:1, :]
    m_dn = m_ref[1:2, :]
    m_lf = m_ref[2:3, :]
    m_rt = m_ref[3:4, :]

    # Vertical neighbours via intra-row rotation (XLU), border taps zeroed.
    # Shifts are kept positive (hw - s == -s mod hw) for lowering safety.
    up = pltpu.roll(x, shift_w, axis=1) * m_up            # x[i-1, j]
    dn = pltpu.roll(x, hw - shift_w, axis=1) * m_dn       # x[i+1, j]

    bv = up + x + x + dn                                  # vertical [1, 2, 1]
    dv = up - dn                                          # vertical [1, 0, -1]

    # Horizontal pass.
    bl = pltpu.roll(bv, 1, axis=1) * m_lf                 # bv[i, j-1]
    br = pltpu.roll(bv, hw - 1, axis=1) * m_rt            # bv[i, j+1]
    dl = pltpu.roll(dv, 1, axis=1) * m_lf                 # dv[i, j-1]
    dr = pltpu.roll(dv, hw - 1, axis=1) * m_rt            # dv[i, j+1]

    gx = bl - br                                          # horizontal [1, 0, -1]
    gy = dl + dv + dv + dr                                # horizontal [1, 2, 1]

    o_ref[...] = (jnp.abs(gx) + jnp.abs(gy)).astype(o_ref.dtype)


def _make_masks(H, W, dtype):
    """(8, H*W) float masks: rows 0..3 = up/down/left/right validity, rest=1."""
    flat = np.arange(H * W)
    col = flat % W
    m_up = flat >= W                     # row > 0
    m_dn = flat < (H - 1) * W            # row < H-1
    m_lf = col > 0                       # col > 0
    m_rt = col < (W - 1)                 # col < W-1
    ones = np.ones_like(m_up)
    m = np.stack([m_up, m_dn, m_lf, m_rt, ones, ones, ones, ones], axis=0)
    return jnp.asarray(m.astype(np.float32), dtype=dtype)


def _pick_bc(nc, hw, itemsize, target_bytes=2 * 1024 * 1024):
    """Rows per block: multiple of 8, ~target_bytes, prefer >=2 grid steps."""
    row_bytes = max(hw * itemsize, 1)
    bc = max(8, (target_bytes // row_bytes) // 8 * 8)
    nc_pad = ((nc + 7) // 8) * 8
    bc = min(bc, nc_pad)
    # Prefer >=2 grid steps so v7x can shard the "parallel" axis across its
    # two TensorCores (no-op on single-core v5e/v6e).
    if nc > 8 and -(-nc // bc) < 2:
        half = -(-nc // 2)
        bc = max(8, ((half + 7) // 8) * 8)
    return bc


def sobelxy(x):
    """Sobelxy.forward: |dwconv(x, sobel)| + |dwconv(x, sobel.T)| (zero pad)."""
    N, C, H, W = x.shape
    NC, HW = N * C, H * W
    x2 = x.reshape(NC, HW)                       # metadata-only reshape

    compute_dtype = jnp.bfloat16 if x.dtype == jnp.bfloat16 else jnp.float32
    masks = _make_masks(H, W, compute_dtype)     # tiny, DMA'd once, resident

    bc = _pick_bc(NC, HW, np.dtype(x.dtype).itemsize)
    grid = (pl.cdiv(NC, bc),)
    # TODO(synk): tile H (with halo exchange) for planes too large to keep a
    # whole flattened plane per 8-row block in VMEM (e.g. >1k x 1k f32 images).

    out = pl.pallas_call(
        functools.partial(_sobelxy_kernel, shift_w=W),
        out_shape=jax.ShapeDtypeStruct((NC, HW), x.dtype),
        grid=grid,
        in_specs=[
            pl.BlockSpec((8, HW), lambda i: (0, 0)),    # masks: constant block
            pl.BlockSpec((bc, HW), lambda i: (i, 0)),   # planes
        ],
        out_specs=pl.BlockSpec((bc, HW), lambda i: (i, 0)),
        compiler_params=pltpu.CompilerParams(
            dimension_semantics=("parallel",),
            vmem_limit_bytes=32 * 1024 * 1024),
    )(masks, x2)
    return out.reshape(N, C, H, W)


def _reference(x):
    # Independent reference: depthwise cross-correlation via lax.conv,
    # matching nn.Conv2d(groups=channels, padding=1, bias=False).
    sobel = jnp.array([[1, 0, -1], [2, 0, -2], [1, 0, -1]], dtype=x.dtype)
    C = x.shape[1]
    wxf = jnp.broadcast_to(sobel[None, None], (C, 1, 3, 3))
    wyf = jnp.broadcast_to(sobel.T[None, None], (C, 1, 3, 3))
    dn = ("NCHW", "OIHW", "NCHW")
    cx = jax.lax.conv_general_dilated(
        x, wxf, (1, 1), ((1, 1), (1, 1)),
        dimension_numbers=dn, feature_group_count=C)
    cy = jax.lax.conv_general_dilated(
        x, wyf, (1, 1), ((1, 1), (1, 1)),
        dimension_numbers=dn, feature_group_count=C)
    return jnp.abs(cx) + jnp.abs(cy)


if __name__ == "__main__":
    key = jax.random.PRNGKey(0)
    x = jax.random.normal(key, (2, 4, 16, 16), dtype=jnp.float32)

    out = jax.block_until_ready(sobelxy(x))

    ref = _reference(x)
    assert out.shape == ref.shape == x.shape
    np.testing.assert_allclose(np.asarray(out), np.asarray(ref),
                               rtol=1e-5, atol=1e-5)
    print("KERNEL_OK")
</pallas_src>

<mosaic_0001>
module attributes {stable_mosaic.version = 11 : i64} {
  func.func @_sobelxy_kernel(%arg0: i32, %arg1: memref<8x256xf32, #tpu.memory_space<vmem>>, %arg2: memref<8x256xf32, #tpu.memory_space<vmem>>, %arg3: memref<8x256xf32, #tpu.memory_space<vmem>>) attributes {dimension_semantics = [#tpu.dimension_semantics<parallel>], iteration_bounds = array<i64: 1>, scalar_prefetch = 0 : i64, scratch_operands = 0 : i64, tpu.core_type = #tpu.core_type<tc>, window_params = [{pipeline_mode = #tpu.pipeline_mode<synchronous>, transform_indices = @transform_0, window_bounds = array<i64: 8, 256>}, {transform_indices = @transform_1, window_bounds = array<i64: 8, 256>}, {transform_indices = @transform_2, window_bounds = array<i64: 8, 256>}]} {
    %c0 = arith.constant 0 : index
    %c0_0 = arith.constant 0 : index
    %0 = vector.load %arg2[%c0, %c0_0] : memref<8x256xf32, #tpu.memory_space<vmem>>, vector<8x256xf32>
    %c0_1 = arith.constant 0 : index
    %c0_2 = arith.constant 0 : index
    %1 = vector.load %arg1[%c0_1, %c0_2] : memref<8x256xf32, #tpu.memory_space<vmem>>, vector<1x256xf32>
    %c1 = arith.constant 1 : index
    %c0_3 = arith.constant 0 : index
    %2 = vector.load %arg1[%c1, %c0_3] : memref<8x256xf32, #tpu.memory_space<vmem>>, vector<1x256xf32>
    %c2 = arith.constant 2 : index
    %c0_4 = arith.constant 0 : index
    %3 = vector.load %arg1[%c2, %c0_4] : memref<8x256xf32, #tpu.memory_space<vmem>>, vector<1x256xf32>
    %c3 = arith.constant 3 : index
    %c0_5 = arith.constant 0 : index
    %4 = vector.load %arg1[%c3, %c0_5] : memref<8x256xf32, #tpu.memory_space<vmem>>, vector<1x256xf32>
    %c16_i32 = arith.constant 16 : i32
    %5 = tpu.dynamic_rotate %0 by %c16_i32 dim 1 : vector<8x256xf32>, i32 -> vector<8x256xf32>
    %6 = vector.broadcast %1 : vector<1x256xf32> to vector<8x256xf32>
    %7 = arith.mulf %5, %6 : vector<8x256xf32>
    %c240_i32 = arith.constant 240 : i32
    %8 = tpu.dynamic_rotate %0 by %c240_i32 dim 1 : vector<8x256xf32>, i32 -> vector<8x256xf32>
    %9 = vector.broadcast %2 : vector<1x256xf32> to vector<8x256xf32>
    %10 = arith.mulf %8, %9 : vector<8x256xf32>
    %11 = arith.addf %7, %0 : vector<8x256xf32>
    %12 = arith.addf %11, %0 : vector<8x256xf32>
    %13 = arith.addf %12, %10 : vector<8x256xf32>
    %14 = arith.subf %7, %10 : vector<8x256xf32>
    %c1_i32 = arith.constant 1 : i32
    %15 = tpu.dynamic_rotate %13 by %c1_i32 dim 1 : vector<8x256xf32>, i32 -> vector<8x256xf32>
    %16 = vector.broadcast %3 : vector<1x256xf32> to vector<8x256xf32>
    %17 = arith.mulf %15, %16 : vector<8x256xf32>
    %c255_i32 = arith.constant 255 : i32
    %18 = tpu.dynamic_rotate %13 by %c255_i32 dim 1 : vector<8x256xf32>, i32 -> vector<8x256xf32>
    %19 = vector.broadcast %4 : vector<1x256xf32> to vector<8x256xf32>
    %20 = arith.mulf %18, %19 : vector<8x256xf32>
    %c1_i32_6 = arith.constant 1 : i32
    %21 = tpu.dynamic_rotate %14 by %c1_i32_6 dim 1 : vector<8x256xf32>, i32 -> vector<8x256xf32>
    %22 = vector.broadcast %3 : vector<1x256xf32> to vector<8x256xf32>
    %23 = arith.mulf %21, %22 : vector<8x256xf32>
    %c255_i32_7 = arith.constant 255 : i32
    %24 = tpu.dynamic_rotate %14 by %c255_i32_7 dim 1 : vector<8x256xf32>, i32 -> vector<8x256xf32>
    %25 = vector.broadcast %4 : vector<1x256xf32> to vector<8x256xf32>
    %26 = arith.mulf %24, %25 : vector<8x256xf32>
    %27 = arith.subf %17, %20 : vector<8x256xf32>
    %28 = arith.addf %23, %14 : vector<8x256xf32>
    %29 = arith.addf %28, %14 : vector<8x256xf32>
    %30 = arith.addf %29, %26 : vector<8x256xf32>
    %31 = math.absf %27 : vector<8x256xf32>
    %32 = math.absf %30 : vector<8x256xf32>
    %33 = arith.addf %31, %32 : vector<8x256xf32>
    %c0_8 = arith.constant 0 : index
    %c0_9 = arith.constant 0 : index
    %34 = vector.load %arg3[%c0_8, %c0_9] : memref<8x256xf32, #tpu.memory_space<vmem>>, vector<8x256xf32>
    tpu.vector_store %arg3[%c0_8, %c0_9], %33 {strides = array<i32>} : memref<8x256xf32, #tpu.memory_space<vmem>>, vector<8x256xf32>,
    return
  }
  func.func @transform_0(%arg0: i32) -> (i32, i32) {
    %c0_i32 = arith.constant 0 : i32
    %c0_i32_0 = arith.constant 0 : i32
    %c0_i32_1 = arith.constant 0 : i32
    return %c0_i32, %c0_i32_0 : i32, i32
  }
  func.func @transform_1(%arg0: i32) -> (i32, i32) {
    %c0_i32 = arith.constant 0 : i32
    %c0_i32_0 = arith.constant 0 : i32
    return %arg0, %c0_i32 : i32, i32
  }
  func.func @transform_2(%arg0: i32) -> (i32, i32) {
    %c0_i32 = arith.constant 0 : i32
    %c0_i32_0 = arith.constant 0 : i32
    return %arg0, %c0_i32 : i32, i32
  }
}

</mosaic_0001>

<bundles_post_ra>
// kernel: tpu_custom_call.1
= control target key start
LH: loop header
LB: loop body
LE: loop exit
PB: predicated region body
PF: predicated region fallthrough
CT: control target
= control target key end

     0   :  { %7 = vsyncpa [#allocation3], 0  ;;  %s342_s0 = inlined_call_operand.hbm [shape: f32[8,256], index: 0, kind: input, shape index: {}]   ;;  %s343_s1 = inlined_call_operand.hbm [shape: f32[8,256], index: 1, kind: input, shape index: {}]   ;;  %s344_s2 = inlined_call_operand.hbm [shape: f32[8,256], index: 2, kind: output, shape index: {}]  }
   0x1   :  { %8 = vsyncpa [#allocation6], 0 }
   0x2   :  { %9 = vsyncpa [#allocation4], 0  ;;  %s262_s9 = smov [#allocation2]   ;;  %s263_s11 = smov [#allocation5]  }
   0x3   :  { %s16_s10 = sshll.u32 %s262_s9, 4  ;;  %s26_s12 = sshll.u32 %s263_s11, 4  ;;  %s17_s10 = int_to_ptr.vmem [resolvable:$true] %s16_s10  ;;  %s27_s12 = int_to_ptr.vmem [resolvable:$true] %s26_s12 }
   0x4   :  { %s190_s15 = scalar_lea.hbm %s342_s0, 256 }
   0x5   :  { %p191_p0 = scmp.ne.s32.totalorder %s342_s0, %s190_s15  ;;  %p194_p1 = scmp.lt.u32.totalorder %s190_s15, %s342_s0 }
   0x7   :  { %p196_p2 = pnand %p194_p1, %p191_p0 }
   0x9   :  { %199 = shalt.err (!%p196_p2)
}
   0xa   :  { %s200_s20 = scalar_lea.vmem %s17_s10, 256  ;;  %p205_p4 = scmp.lt.s32.totalorder %s17_s10, %s17_s10 }
   0xb   :  { %p201_p3 = scmp.ne.s32.totalorder %s17_s10, %s200_s20  ;;  %p206_p5 = scmp.lt.s32.totalorder %s200_s20, %s200_s20 }
   0xd   :  { %p207_p6 = por %p206_p5, %p205_p4 }
   0xf   :  { %p208_p7 = pnand %p207_p6, %p201_p3 }
  0x11   :  { %211 = shalt.err (!%p208_p7)
}
  0x12   :  { %19 = dma.hbm_to_vmem [thread:$0]  %s342_s0, 256, %s17_s10, [#allocation3]  }
  0x13   :  { %s212_s25 = scalar_lea.hbm %s343_s1, 256 }
  0x14   :  { %p213_p8 = scmp.ne.s32.totalorder %s343_s1, %s212_s25  ;;  %p216_p9 = scmp.lt.u32.totalorder %s212_s25, %s343_s1 }
  0x16   :  { %p218_p10 = pnand %p216_p9, %p213_p8 }
  0x18   :  { %221 = shalt.err (!%p218_p10)
}
  0x19   :  { %s222_s30 = scalar_lea.vmem %s27_s12, 256  ;;  %p227_p12 = scmp.lt.s32.totalorder %s27_s12, %s27_s12 }
  0x1a   :  { %p223_p11 = scmp.ne.s32.totalorder %s27_s12, %s222_s30  ;;  %p228_p13 = scmp.lt.s32.totalorder %s222_s30, %s222_s30 }
  0x1c   :  { %p229_p0 = por %p228_p13, %p227_p12 }
  0x1e   :  { %p230_p1 = pnand %p229_p0, %p223_p11 }
  0x20   :  { %233 = shalt.err (!%p230_p1)
}
  0x21   :  { %29 = dma.hbm_to_vmem [thread:$0]  %s343_s1, 256, %s27_s12, [#allocation6]  }
  0x22   :  { %256 = dma.done.wait [#allocation3], 256  }
  0x23   :  { %257 = vsyncadd [#allocation3], 4294967040 }
  0x24   :  { %258 = dma.done.wait [#allocation6], 256  }
  0x25   :  { %259 = vsyncadd [#allocation6], 4294967040  ;;  %v36_v0 = vld [vmem:[#allocation5] sm:$0xff]  ;;  %s264_s4 = smov 112   ;;  %s265_s5 = smov 16   ;;  %v37_v1 = vld [vmem:[#allocation5 + $0x8] sm:$0xff]  ;;  %v49_v2 = vlaneseq }
  0x26   :  { %67 = vrot.lane.b32.xlu1 %v36_v0, %s264_s4  ;;  %45 = vrot.lane.b32.xlu0 %v36_v0, %s265_s5  ;;  %v40_v7 = vld [vmem:[#allocation2 + $0x1] ss:$8 sm:$0x3]  ;;  %v38_v8 = vld [vmem:[#allocation2] ss:$8 sm:$0x3] }
  0x27   :  { %v56_v3 = vshrl.u32 %v49_v2, 7  ;;  %v308_v4 = vand.u32 127, %v49_v2  ;;  %s266_s1 = smov 1   ;;  %s267_s6 = smov 127  }
  0x28   :  { %v42_v33 = vld [vmem:[#allocation2 + $0x2] ss:$8 sm:$0x3]  ;;  %v44_v40 = vld [vmem:[#allocation2 + $0x3] ss:$8 sm:$0x3] }
  0x29   :  { %v57_v5 = vsub.s32 0, %v56_v3  ;;  %v61_v6 = vsub.s32 1, %v56_v3  ;;  %vm71_vm0 = vcmp.lt.s32.totalorder %v308_v4, 112  ;;  %vm51_vm1 = vcmp.lt.s32.totalorder %v308_v4, 16  ;;  %s268_s7 = smov [#allocation7]  }
  0x2a   :  { %69 = vrot.lane.b32.xlu1 %v37_v1, %s264_s4  ;;  %47 = vrot.lane.b32.xlu0 %v37_v1, %s265_s5  ;;  %vm99_vm2 = vcmp.lt.s32.totalorder %v308_v4, 1  ;;  %vm119_vm3 = vcmp.lt.s32.totalorder %v308_v4, 127  ;;  %s173_s8 = sshll.u32 %s268_s7, 4  ;;  %s174_s8 = int_to_ptr.vmem [resolvable:$true] %s173_s8 }
  0x2b   :  { %v78_v11 = vrot.slane %v40_v7, %v57_v5  ;;  %v82_v12 = vrot.slane %v40_v7, %v61_v6  ;;  %v58_v13 = vrot.slane %v38_v8, %v57_v5  ;;  %v62_v14 = vrot.slane %v38_v8, %v61_v6  ;;  %s234_s9 = scalar_lea.vmem %s174_s8, 256  ;;  %p239_p3 = scmp.lt.s32.totalorder %s174_s8, %s174_s8 }
  0x2c   :  { %v106_v36 = vrot.slane %v42_v33, %v57_v5  ;;  %v110_v37 = vrot.slane %v42_v33, %v61_v6  ;;  %v126_v45 = vrot.slane %v44_v40, %v57_v5  ;;  %v130_v46 = vrot.slane %v44_v40, %v61_v6  ;;  %p235_p2 = scmp.ne.s32.totalorder %s174_s8, %s234_s9  ;;  %p240_p4 = scmp.lt.s32.totalorder %s234_s9, %s234_s9 }
  0x2e   :  { %p241_p5 = por %p240_p4, %p239_p3 }
  0x30   :  { %p242_p6 = pnand %p241_p5, %p235_p2 }
  0x98   :  { %v68_v9 = vpop.permute.xlu1 %67  ;;  %v46_v10 = vpop.permute.xlu0 %45 }
  0x9c   :  { %v70_v15 = vpop.permute.xlu1 %69  ;;  %v48_v16 = vpop.permute.xlu0 %47 }
  0x9d   :  { %v72_v17 = vsel %vm71_vm0, %v68_v9, %v70_v15  ;;  %v73_v18 = vsel %vm71_vm0, %v70_v15, %v68_v9  ;;  %v52_v19 = vsel %vm51_vm1, %v46_v10, %v48_v16  ;;  %v53_v20 = vsel %vm51_vm1, %v48_v16, %v46_v10 }
  0x9e   :  { %v85_v21 = vmul.f32 %v78_v11, %v72_v17  ;;  %v86_v22 = vmul.f32 %v82_v12, %v73_v18  ;;  %v65_v23 = vmul.f32 %v58_v13, %v53_v20  ;;  %v66_v24 = vmul.f32 %v62_v14, %v52_v19 }
  0xa0   :  { %v87_v25 = vadd.f32 %v65_v23, %v36_v0  ;;  %v88_v26 = vadd.f32 %v66_v24, %v37_v1  ;;  %v93_v27 = vsub.f32 %v65_v23, %v85_v21  ;;  %v94_v28 = vsub.f32 %v66_v24, %v86_v22 }
  0xa2   :  { %135 = vrot.lane.b32.xlu0 %v93_v27, %s266_s1  ;;  %137 = vrot.lane.b32.xlu1 %v94_v28, %s266_s1  ;;  %v89_v29 = vadd.f32 %v87_v25, %v36_v0  ;;  %v90_v30 = vadd.f32 %v88_v26, %v37_v1 }
  0xa4   :  { %v91_v31 = vadd.f32 %v89_v29, %v85_v21  ;;  %v92_v32 = vadd.f32 %v90_v30, %v86_v22 }
  0xa6   :  { %95 = vrot.lane.b32.xlu0 %v91_v31, %s266_s1  ;;  %97 = vrot.lane.b32.xlu1 %v92_v32, %s266_s1 }
  0xaa   :  { %115 = vrot.lane.b32.xlu0 %v91_v31, %s267_s6  ;;  %117 = vrot.lane.b32.xlu1 %v92_v32, %s267_s6 }
  0xae   :  { %143 = vrot.lane.b32.xlu0 %v93_v27, %s267_s6  ;;  %145 = vrot.lane.b32.xlu1 %v94_v28, %s267_s6 }
 0x114   :  { %v136_v34 = vpop.permute.xlu0 %135  ;;  %v138_v35 = vpop.permute.xlu1 %137 }
 0x115   :  { %v140_v38 = vsel %vm99_vm2, %v138_v35, %v136_v34  ;;  %v139_v39 = vsel %vm99_vm2, %v136_v34, %v138_v35 }
 0x116   :  { %v141_v43 = vmul.f32 %v140_v38, %v106_v36  ;;  %v142_v44 = vmul.f32 %v139_v39, %v110_v37 }
 0x118   :  { %v96_v41 = vpop.permute.xlu0 %95  ;;  %v98_v42 = vpop.permute.xlu1 %97  ;;  %v153_v50 = vadd.f32 %v141_v43, %v93_v27  ;;  %v154_v54 = vadd.f32 %v142_v44, %v94_v28 }
 0x119   :  { %v101_v47 = vsel %vm99_vm2, %v98_v42, %v96_v41  ;;  %v100_v51 = vsel %vm99_vm2, %v96_v41, %v98_v42 }
 0x11a   :  { %v113_v57 = vmul.f32 %v106_v36, %v101_v47  ;;  %v114_v58 = vmul.f32 %v110_v37, %v100_v51  ;;  %v155_v62 = vadd.f32 %v153_v50, %v93_v27  ;;  %v156_v2 = vadd.f32 %v154_v54, %v94_v28 }
 0x11c   :  { %v116_v48 = vpop.permute.xlu0 %115  ;;  %v118_v49 = vpop.permute.xlu1 %117 }
 0x11d   :  { %v120_v52 = vsel %vm119_vm3, %v116_v48, %v118_v49  ;;  %v121_v53 = vsel %vm119_vm3, %v118_v49, %v116_v48 }
 0x11e   :  { %v133_v55 = vmul.f32 %v126_v45, %v120_v52  ;;  %v134_v56 = vmul.f32 %v130_v46, %v121_v53 }
 0x120   :  { %v144_v59 = vpop.permute.xlu0 %143  ;;  %v146_v60 = vpop.permute.xlu1 %145  ;;  %v151_v61 = vsub.f32 %v113_v57, %v133_v55  ;;  %v152_v1 = vsub.f32 %v114_v58, %v134_v56 }
 0x121   :  { %v147_v63 = vsel %vm119_vm3, %v144_v59, %v146_v60  ;;  %v148_v0 = vsel %vm119_vm3, %v146_v60, %v144_v59 }
 0x122   :  { %v149_v3 = vmul.f32 %v147_v63, %v126_v45  ;;  %v150_v5 = vmul.f32 %v148_v0, %v130_v46  ;;  %v159_v8 = vand.u32 2147483647, %v151_v61  ;;  %v160_v9 = vand.u32 2147483647, %v152_v1 }
 0x124   :  { %v157_v6 = vadd.f32 %v155_v62, %v149_v3  ;;  %v158_v7 = vadd.f32 %v156_v2, %v150_v5 }
 0x126   :  { %v161_v10 = vand.u32 2147483647, %v157_v6  ;;  %v162_v11 = vand.u32 2147483647, %v158_v7 }
 0x128   :  { %v163_v12 = vadd.f32 %v161_v10, %v159_v8  ;;  %v164_v13 = vadd.f32 %v162_v11, %v160_v9 }
 0x12a   :  { %165 = vst [vmem:[#allocation7] sm:$0xff] %v163_v12  ;;  %166 = vst [vmem:[#allocation7 + $0x8] sm:$0xff] %v164_v13 }
 0x12b   :  { %245 = shalt.err (!%p242_p6)
}
 0x12c   :  { %s246_s12 = scalar_lea.hbm %s344_s2, 256 }
 0x12d   :  { %p247_p7 = scmp.ne.s32.totalorder %s344_s2, %s246_s12  ;;  %p250_p8 = scmp.lt.u32.totalorder %s246_s12, %s344_s2 }
 0x12f   :  { %p252_p9 = pnand %p250_p8, %p247_p7 }
 0x131   :  { %255 = shalt.err (!%p252_p9)
}
 0x132   :  { %176 = dma.vmem_to_hbm [thread:$0]  %s174_s8, 256, %s344_s2, [#allocation4]  }
 0x133   :  { %260 = dma.done.wait [#allocation4], 256  }
 0x134   :  { %261 = vsyncadd [#allocation4], 4294967040 }
 0x135   :  { %180 = vsyncpa [#allocation3], 1 }
 0x136   :  { %181 = vsyncpa [#allocation6], 1 }
 0x137   :  { %182 = vsyncpa [#allocation4], 1 }

</bundles_post_ra>
